<compile_context>
chip_gen: v5e
topology: v5e:2x2
jax: 0.10.0
libtpu: 0.0.40
codegen_flags: <defaults>
</compile_context>

<pallas_src>
import functools
import numpy as np
import jax
import jax.numpy as jnp
from jax.experimental import pallas as pl
from jax.experimental.pallas import tpu as pltpu


ENV_PARAMS = {"S0": 100.0, "max_alpha": 5.0, "Ndt": 10.0}

_HIGHEST = jax.lax.Precision.HIGHEST


# ----------------------------------------------------------------------------
# Kernel
# ----------------------------------------------------------------------------
def _policy_kernel(xt_ref, w1t_ref, b1t_ref, wht_ref, bht_ref, wn_ref, bn_ref,
                   out_ref, *, max_alpha, n_hidden):
    # xt:  (F, block_b)   lane-dense over batch (normalization already folded
    #                     into layer1 weights on the host, one time)
    # h :  (H, block_b)   lane-dense activations
    xt = xt_ref[...].astype(jnp.float32)

    # --- layer1 (folded normalization) + SiLU ---
    # NOTE: HIGHEST precision is fine at H=32 (hides under fixed overhead);
    # if hidden_size grows >=256, switch to DEFAULT / bf16 weights.
    h = jnp.dot(w1t_ref[...], xt,
                preferred_element_type=jnp.float32,
                precision=_HIGHEST) + b1t_ref[...]
    h = h * jax.lax.logistic(h)                      # SiLU

    # --- hidden layers + SiLU (static unroll, n_hidden = n_layers - 1) ---
    for l in range(n_hidden):
        h = jnp.dot(wht_ref[l], h,
                    preferred_element_type=jnp.float32,
                    precision=_HIGHEST) + bht_ref[l]
        h = h * jax.lax.logistic(h)

    # --- layerN: (H,1) column broadcast-multiplied on the VPU, then a
    #     sublane (axis-0) sum on the XLU.  Avoids an M=1 MXU matmul. ---
    loc = jnp.sum(wn_ref[...] * h, axis=0, keepdims=True) + bn_ref[0, 0]
    out_ref[...] = jnp.clip(loc, -max_alpha, max_alpha).reshape(out_ref.shape)


# ----------------------------------------------------------------------------
# One-time parameter preparation (hoist out of the hot loop!)
# ----------------------------------------------------------------------------
def prepare_params(params, env_params):
    """Fold the affine feature normalization into layer1 and transpose all
    weights into the kernel's lane-dense layout.  Call ONCE, outside the hot
    loop (or close over the result inside jit so XLA constant-folds it).

        xn @ w1 + b1 == x @ (scale[:,None]*w1) + (offset @ w1 + b1)
    """
    w1, b1, wh, bh, wn, bn = params
    s0 = float(env_params["S0"])
    max_alpha = float(env_params["max_alpha"])
    ndt = float(env_params["Ndt"])

    scale = jnp.array([2.0 / s0, 1.0 / max_alpha, 1.0 / ndt], jnp.float32)
    offset = jnp.array([-1.0, 0.0, 0.0], jnp.float32)

    w1t = (scale[:, None] * w1).T.astype(jnp.float32)        # (H, F)
    b1t = (b1 + offset @ w1).T.astype(jnp.float32)           # (H, 1)
    wht = jnp.transpose(wh, (0, 2, 1)).astype(jnp.float32)   # (L, H, H)
    bht = jnp.transpose(bh, (0, 2, 1)).astype(jnp.float32)   # (L, H, 1)
    wnc = wn.astype(jnp.float32).reshape(-1, 1)              # (H, 1) column
    bn2 = bn.astype(jnp.float32).reshape(1, 1)               # (1, 1) -> SMEM
    return (w1t, b1t, wht, bht, wnc, bn2)


def _default_max_tile_lanes(hidden_size):
    # ~8 MiB VMEM budget for per-lane state: f32 activations (4*H B/lane) plus
    # double-buffered x/out tiles (sublane-padded, ~256 B/lane).
    budget = 8 * 1024 * 1024
    lanes = budget // (4 * hidden_size + 256)
    lanes -= lanes % 128
    return max(128, min(32768, int(lanes)))


def _choose_block_b(batch, block_b, hidden_size):
    if block_b is None:
        max_lanes = _default_max_tile_lanes(hidden_size)
        if batch <= max_lanes:
            return batch                       # single grid step (v5e/v6e default)
        cand = min(max_lanes, batch)
        cand -= cand % 128
        while cand >= 128:
            if batch % cand == 0:
                return cand
            cand -= 128
        return batch                           # fallback: one big block
    if block_b != batch:
        if block_b % 128 != 0:
            raise ValueError(
                "block_b must be a multiple of 128 lanes when tiling the batch "
                "(a 64-wide tile violates the (8,128) block rule).")
        if batch % block_b != 0:
            raise ValueError("batch must be a multiple of block_b")
    return block_b


# ----------------------------------------------------------------------------
# Forward wrapper
# ----------------------------------------------------------------------------
def policy_forward(x, prepared_params, env_params, *, block_b=None,
                   weight_buffer_count=None):
    """Returns (loc, scale) exactly like PolicyApprox.forward.

    x:               (B, 3) raw features (price S, inventory alpha, time t).
    prepared_params: output of prepare_params() — compute it ONCE.
    block_b:         batch tile width.
      * Default: single grid step when the block fits the VMEM budget
        (best on v5e/v6e: 1 TensorCore per chip, the grid is a serial loop).
      * v7x (2 TensorCores): split only when block_b = B // 2 is a multiple
        of 128 and preferably >= 512; NEVER tile below 128 lanes.
    weight_buffer_count: set to 1 to single-buffer the grid-invariant weight
      inputs (pl.Buffered) when hidden_size is large and the batch is tiled.
    """
    w1t, b1t, wht, bht, wnc, bn2 = prepared_params
    B, F = x.shape
    H, Fw = w1t.shape
    assert F == Fw == 3, "normalization fold assumes 3 features (S, alpha, t)"
    L = wht.shape[0]
    max_alpha = float(env_params["max_alpha"])

    block_b = _choose_block_b(B, block_b, H)
    num_tiles = B // block_b

    # Lane-dense (F, B) layout for the batch.  Under jit, allow_input_fusion
    # lets XLA fuse this transpose/convert into the pallas_call operand so it
    # does not cost a separate HBM pass.
    xt = x.T.astype(jnp.float32)                               # (F, B)

    def _wspec(shape):
        idx = lambda i, _n=len(shape): (0,) * _n
        if weight_buffer_count is None:
            return pl.BlockSpec(shape, idx)
        return pl.BlockSpec(shape, idx,
                            pipeline_mode=pl.Buffered(weight_buffer_count))

    kernel = functools.partial(_policy_kernel, max_alpha=max_alpha, n_hidden=L)

    weight_bytes = 4 * (w1t.size + b1t.size + wht.size + bht.size
                        + wnc.size + bn2.size)
    cost = pl.CostEstimate(
        flops=int(2 * B * (F * H + L * H * H + H) + 4 * B * H * (L + 1)),
        transcendentals=int(B * H * (L + 1)),
        bytes_accessed=int(4 * B * F + 4 * B + weight_bytes),
    )

    out = pl.pallas_call(
        kernel,
        out_shape=jax.ShapeDtypeStruct((num_tiles, 1, block_b), jnp.float32),
        grid_spec=pltpu.PrefetchScalarGridSpec(
            num_scalar_prefetch=0,
            grid=(num_tiles,),
            in_specs=[
                pl.BlockSpec((F, block_b), lambda i: (0, i)),       # x^T tile
                _wspec((H, F)),                                     # layer1 W^T (folded)
                _wspec((H, 1)),                                     # layer1 b   (folded)
                _wspec((L, H, H)),                                  # hidden W^T (stacked)
                _wspec((L, H, 1)),                                  # hidden b   (stacked)
                _wspec((H, 1)),                                     # layerN W column
                pl.BlockSpec(memory_space=pltpu.MemorySpace.SMEM),  # layerN bias (scalar)
            ],
            out_specs=pl.BlockSpec((1, 1, block_b), lambda i: (i, 0, 0)),
        ),
        compiler_params=pltpu.CompilerParams(
            dimension_semantics=("parallel",),
            # Only the x^T operand (index 0) may be fused into the kernel.
            allow_input_fusion=[True, False, False, False, False, False, False],
        ),
        cost_estimate=cost,
    )(xt, w1t, b1t, wht, bht, wnc, bn2)

    loc = out.reshape(B, 1)
    scale_out = 0.03
    return loc, scale_out


# ----------------------------------------------------------------------------
# Init + pure-JAX reference
# ----------------------------------------------------------------------------
def init_params(key, input_size, hidden_size, n_layers):
    """Deterministic synthetic init mirroring the module's __init__:
    weights ~ N(0, (1/sqrt(input_size)/2)^2), biases = 0.
    Weights stored as (in_features, out_features)."""
    assert n_layers >= 2
    std = 1.0 / np.sqrt(input_size) / 2.0
    k1, k2, k3 = jax.random.split(key, 3)
    L = n_layers - 1
    w1 = jax.random.normal(k1, (input_size, hidden_size), jnp.float32) * std
    b1 = jnp.zeros((1, hidden_size), jnp.float32)
    wh = jax.random.normal(k2, (L, hidden_size, hidden_size), jnp.float32) * std
    bh = jnp.zeros((L, 1, hidden_size), jnp.float32)
    wn = jax.random.normal(k3, (hidden_size, 1), jnp.float32) * std
    bn = jnp.zeros((1, 1), jnp.float32)
    return (w1, b1, wh, bh, wn, bn)


def policy_forward_ref(x, params, env_params):
    """Pure-JAX reference of PolicyApprox.forward for verification."""
    w1, b1, wh, bh, wn, bn = params
    s0, max_alpha, ndt = (env_params["S0"], env_params["max_alpha"],
                          env_params["Ndt"])
    xn = jnp.stack([2.0 * x[:, 0] / s0 - 1.0,
                    x[:, 1] / max_alpha,
                    x[:, 2] / ndt], axis=-1)
    h = jax.nn.silu(jnp.dot(xn, w1, precision=_HIGHEST) + b1)
    for l in range(wh.shape[0]):
        h = jax.nn.silu(jnp.dot(h, wh[l], precision=_HIGHEST) + bh[l])
    loc = jnp.clip(jnp.dot(h, wn, precision=_HIGHEST) + bn, -max_alpha, max_alpha)
    return loc, 0.03


if __name__ == "__main__":
    input_size = 3       # (price S, inventory alpha, time step t)
    hidden_size = 32
    n_layers = 3         # layer1 + 2 hidden + layerN
    batch = 128

    key = jax.random.PRNGKey(0)
    kp, kx = jax.random.split(key)
    params = init_params(kp, input_size, hidden_size, n_layers)

    # Synthetic state features roughly in the environment's native ranges.
    ks, ka, kt = jax.random.split(kx, 3)
    x = jnp.stack(
        [
            ENV_PARAMS["S0"] * (1.0 + 0.1 * jax.random.normal(ks, (batch,))),
            ENV_PARAMS["max_alpha"] * jax.random.uniform(ka, (batch,), minval=-1.0, maxval=1.0),
            jnp.floor(ENV_PARAMS["Ndt"] * jax.random.uniform(kt, (batch,))),
        ],
        axis=-1,
    ).astype(jnp.float32)

    # One-time parameter prep (hoisted out of the hot loop).
    prepared = jax.block_until_ready(prepare_params(params, ENV_PARAMS))

    # Eager call — returns (loc, 0.03) exactly like the module.
    loc, scale = policy_forward(x, prepared, ENV_PARAMS)
    loc = jax.block_until_ready(loc)

    # Hot-loop usage: jit the forward so the x-transpose fuses into the
    # pallas_call operand and the prepared params are constant-folded.
    fwd_jit = jax.jit(lambda xb: policy_forward(xb, prepared, ENV_PARAMS)[0])
    loc_jit = jax.block_until_ready(fwd_jit(x))

    loc_ref, _ = policy_forward_ref(x, params, ENV_PARAMS)
    np.testing.assert_allclose(np.asarray(loc), np.asarray(loc_ref),
                               rtol=1e-4, atol=1e-5)
    np.testing.assert_allclose(np.asarray(loc_jit), np.asarray(loc_ref),
                               rtol=1e-4, atol=1e-5)
    assert loc.shape == (batch, 1) and scale == 0.03

    print("KERNEL_OK")
</pallas_src>

<mosaic_0001>
module attributes {stable_mosaic.version = 11 : i64} {
  func.func @_policy_kernel(%arg0: i32, %arg1: memref<3x128xf32, #tpu.memory_space<vmem>>, %arg2: memref<32x3xf32, #tpu.memory_space<vmem>>, %arg3: memref<32x1xf32, #tpu.memory_space<vmem>>, %arg4: memref<2x32x32xf32, #tpu.memory_space<vmem>>, %arg5: memref<2x32x1xf32, #tpu.memory_space<vmem>>, %arg6: memref<32x1xf32, #tpu.memory_space<vmem>>, %arg7: memref<1x1xf32, #tpu.memory_space<smem>>, %arg8: memref<1x1x128xf32, #tpu.memory_space<vmem>>) attributes {dimension_semantics = [#tpu.dimension_semantics<parallel>], iteration_bounds = array<i64: 1>, scalar_prefetch = 0 : i64, scratch_operands = 0 : i64, tpu.core_type = #tpu.core_type<tc>, window_params = [{transform_indices = @transform_0, window_bounds = array<i64: 3, 128>}, {pipeline_mode = #tpu.pipeline_mode<synchronous>, transform_indices = @transform_1, window_bounds = array<i64: 32, 3>}, {pipeline_mode = #tpu.pipeline_mode<synchronous>, transform_indices = @transform_2, window_bounds = array<i64: 32, 1>}, {pipeline_mode = #tpu.pipeline_mode<synchronous>, transform_indices = @transform_3, window_bounds = array<i64: 2, 32, 32>}, {pipeline_mode = #tpu.pipeline_mode<synchronous>, transform_indices = @transform_4, window_bounds = array<i64: 2, 32, 1>}, {pipeline_mode = #tpu.pipeline_mode<synchronous>, transform_indices = @transform_5, window_bounds = array<i64: 32, 1>}, {transform_indices = @transform_6, window_bounds = array<i64: 1, 1>}, {transform_indices = @transform_7, window_bounds = array<i64: 1, 1, 128>}]} {
    %c0 = arith.constant 0 : index
    %c0_0 = arith.constant 0 : index
    %0 = vector.load %arg1[%c0, %c0_0] : memref<3x128xf32, #tpu.memory_space<vmem>>, vector<3x128xf32>
    %c0_1 = arith.constant 0 : index
    %c0_2 = arith.constant 0 : index
    %1 = vector.load %arg2[%c0_1, %c0_2] : memref<32x3xf32, #tpu.memory_space<vmem>>, vector<32x3xf32>
    %cst = arith.constant dense<0.000000e+00> : vector<32x128xf32>
    %2 = tpu.matmul %1, %0, %cst {dimension_numbers = #tpu.dot_dimension_numbers<[1], [0], [0], [1], [0, 0, 1, 1], [], []>, precision = #tpu.contract_precision<fp32>} : vector<32x3xf32>, vector<3x128xf32>, vector<32x128xf32> -> vector<32x128xf32>
    %c0_3 = arith.constant 0 : index
    %c0_4 = arith.constant 0 : index
    %3 = vector.load %arg3[%c0_3, %c0_4] : memref<32x1xf32, #tpu.memory_space<vmem>>, vector<32x1xf32>
    %4 = vector.broadcast %3 : vector<32x1xf32> to vector<32x128xf32>
    %5 = arith.addf %2, %4 : vector<32x128xf32>
    %6 = arith.negf %5 : vector<32x128xf32>
    %7 = math.exp %6 : vector<32x128xf32>
    %cst_5 = arith.constant 1.000000e+00 : f32
    %8 = vector.broadcast %cst_5 : f32 to vector<32x128xf32>
    %9 = arith.addf %8, %7 : vector<32x128xf32>
    %10 = arith.divf %8, %9 : vector<32x128xf32>
    %11 = arith.mulf %5, %10 : vector<32x128xf32>
    %c0_6 = arith.constant 0 : index
    %c0_7 = arith.constant 0 : index
    %c0_8 = arith.constant 0 : index
    %12 = vector.load %arg4[%c0_6, %c0_7, %c0_8] : memref<2x32x32xf32, #tpu.memory_space<vmem>>, vector<1x32x32xf32>
    %13 = vector.shape_cast %12 : vector<1x32x32xf32> to vector<32x32xf32>
    %cst_9 = arith.constant dense<0.000000e+00> : vector<32x128xf32>
    %14 = tpu.matmul %13, %11, %cst_9 {dimension_numbers = #tpu.dot_dimension_numbers<[1], [0], [0], [1], [0, 0, 1, 1], [], []>, precision = #tpu.contract_precision<fp32>} : vector<32x32xf32>, vector<32x128xf32>, vector<32x128xf32> -> vector<32x128xf32>
    %c0_10 = arith.constant 0 : index
    %c0_11 = arith.constant 0 : index
    %c0_12 = arith.constant 0 : index
    %15 = vector.load %arg5[%c0_10, %c0_11, %c0_12] : memref<2x32x1xf32, #tpu.memory_space<vmem>>, vector<1x32x1xf32>
    %16 = vector.shape_cast %15 : vector<1x32x1xf32> to vector<32x1xf32>
    %17 = vector.broadcast %16 : vector<32x1xf32> to vector<32x128xf32>
    %18 = arith.addf %14, %17 : vector<32x128xf32>
    %19 = arith.negf %18 : vector<32x128xf32>
    %20 = math.exp %19 : vector<32x128xf32>
    %cst_13 = arith.constant 1.000000e+00 : f32
    %21 = vector.broadcast %cst_13 : f32 to vector<32x128xf32>
    %22 = arith.addf %21, %20 : vector<32x128xf32>
    %23 = arith.divf %21, %22 : vector<32x128xf32>
    %24 = arith.mulf %18, %23 : vector<32x128xf32>
    %c1 = arith.constant 1 : index
    %c0_14 = arith.constant 0 : index
    %c0_15 = arith.constant 0 : index
    %25 = vector.load %arg4[%c1, %c0_14, %c0_15] : memref<2x32x32xf32, #tpu.memory_space<vmem>>, vector<1x32x32xf32>
    %26 = vector.shape_cast %25 : vector<1x32x32xf32> to vector<32x32xf32>
    %cst_16 = arith.constant dense<0.000000e+00> : vector<32x128xf32>
    %27 = tpu.matmul %26, %24, %cst_16 {dimension_numbers = #tpu.dot_dimension_numbers<[1], [0], [0], [1], [0, 0, 1, 1], [], []>, precision = #tpu.contract_precision<fp32>} : vector<32x32xf32>, vector<32x128xf32>, vector<32x128xf32> -> vector<32x128xf32>
    %c1_17 = arith.constant 1 : index
    %c0_18 = arith.constant 0 : index
    %c0_19 = arith.constant 0 : index
    %28 = vector.load %arg5[%c1_17, %c0_18, %c0_19] : memref<2x32x1xf32, #tpu.memory_space<vmem>>, vector<1x32x1xf32>
    %29 = vector.shape_cast %28 : vector<1x32x1xf32> to vector<32x1xf32>
    %30 = vector.broadcast %29 : vector<32x1xf32> to vector<32x128xf32>
    %31 = arith.addf %27, %30 : vector<32x128xf32>
    %32 = arith.negf %31 : vector<32x128xf32>
    %33 = math.exp %32 : vector<32x128xf32>
    %cst_20 = arith.constant 1.000000e+00 : f32
    %34 = vector.broadcast %cst_20 : f32 to vector<32x128xf32>
    %35 = arith.addf %34, %33 : vector<32x128xf32>
    %36 = arith.divf %34, %35 : vector<32x128xf32>
    %37 = arith.mulf %31, %36 : vector<32x128xf32>
    %c0_21 = arith.constant 0 : index
    %c0_22 = arith.constant 0 : index
    %38 = vector.load %arg6[%c0_21, %c0_22] : memref<32x1xf32, #tpu.memory_space<vmem>>, vector<32x1xf32>
    %39 = vector.broadcast %38 : vector<32x1xf32> to vector<32x128xf32>
    %40 = arith.mulf %39, %37 : vector<32x128xf32>
    %cst_23 = arith.constant dense<0.000000e+00> : vector<128xf32>
    %41 = vector.multi_reduction <add>, %40, %cst_23 [0] : vector<32x128xf32> to vector<128xf32>
    %42 = vector.shape_cast %41 : vector<128xf32> to vector<1x128xf32>
    %c0_24 = arith.constant 0 : index
    %c0_25 = arith.constant 0 : index
    %43 = memref.load %arg7[%c0_24, %c0_25] : memref<1x1xf32, #tpu.memory_space<smem>>
    %44 = vector.broadcast %43 : f32 to vector<1x128xf32>
    %45 = arith.addf %42, %44 : vector<1x128xf32>
    %cst_26 = arith.constant -5.000000e+00 : f32
    %cst_27 = arith.constant 5.000000e+00 : f32
    %46 = vector.broadcast %cst_26 : f32 to vector<1x128xf32>
    %47 = arith.maximumf %46, %45 : vector<1x128xf32>
    %48 = vector.broadcast %cst_27 : f32 to vector<1x128xf32>
    %49 = arith.minimumf %48, %47 : vector<1x128xf32>
    %50 = vector.shape_cast %49 : vector<1x128xf32> to vector<1x1x128xf32>
    %c0_28 = arith.constant 0 : index
    %c0_29 = arith.constant 0 : index
    %c0_30 = arith.constant 0 : index
    %51 = vector.load %arg8[%c0_28, %c0_29, %c0_30] : memref<1x1x128xf32, #tpu.memory_space<vmem>>, vector<1x1x128xf32>
    tpu.vector_store %arg8[%c0_28, %c0_29, %c0_30], %50 {strides = array<i32>} : memref<1x1x128xf32, #tpu.memory_space<vmem>>, vector<1x1x128xf32>,
    return
  }
  func.func @transform_0(%arg0: i32) -> (i32, i32) {
    %c0_i32 = arith.constant 0 : i32
    %c0_i32_0 = arith.constant 0 : i32
    return %c0_i32, %arg0 : i32, i32
  }
  func.func @transform_1(%arg0: i32) -> (i32, i32) {
    %c0_i32 = arith.constant 0 : i32
    %c0_i32_0 = arith.constant 0 : i32
    %c0_i32_1 = arith.constant 0 : i32
    return %c0_i32, %c0_i32_0 : i32, i32
  }
  func.func @transform_2(%arg0: i32) -> (i32, i32) {
    %c0_i32 = arith.constant 0 : i32
    %c0_i32_0 = arith.constant 0 : i32
    %c0_i32_1 = arith.constant 0 : i32
    return %c0_i32, %c0_i32_0 : i32, i32
  }
  func.func @transform_3(%arg0: i32) -> (i32, i32, i32) {
    %c0_i32 = arith.constant 0 : i32
    %c0_i32_0 = arith.constant 0 : i32
    %c0_i32_1 = arith.constant 0 : i32
    %c0_i32_2 = arith.constant 0 : i32
    return %c0_i32, %c0_i32_0, %c0_i32_1 : i32, i32, i32
  }
  func.func @transform_4(%arg0: i32) -> (i32, i32, i32) {
    %c0_i32 = arith.constant 0 : i32
    %c0_i32_0 = arith.constant 0 : i32
    %c0_i32_1 = arith.constant 0 : i32
    %c0_i32_2 = arith.constant 0 : i32
    return %c0_i32, %c0_i32_0, %c0_i32_1 : i32, i32, i32
  }
  func.func @transform_5(%arg0: i32) -> (i32, i32) {
    %c0_i32 = arith.constant 0 : i32
    %c0_i32_0 = arith.constant 0 : i32
    %c0_i32_1 = arith.constant 0 : i32
    return %c0_i32, %c0_i32_0 : i32, i32
  }
  func.func @transform_6(%arg0: i32) -> (i32, i32) {
    %c0_i32 = arith.constant 0 : i32
    %c0_i32_0 = arith.constant 0 : i32
    %c0_i32_1 = arith.constant 0 : i32
    return %c0_i32, %c0_i32_0 : i32, i32
  }
  func.func @transform_7(%arg0: i32) -> (i32, i32, i32) {
    %c0_i32 = arith.constant 0 : i32
    %c0_i32_0 = arith.constant 0 : i32
    %c0_i32_1 = arith.constant 0 : i32
    return %arg0, %c0_i32, %c0_i32_0 : i32, i32, i32
  }
}

</mosaic_0001>

<bundles_post_ra>
// kernel: tpu_custom_call.1
= control target key start
LH: loop header
LB: loop body
LE: loop exit
PB: predicated region body
PF: predicated region fallthrough
CT: control target
= control target key end

     0   :  { %vm70_vm0 = vcmask 1042432   ;;  %vm57_vm1 = vcmask 23552   ;;  %v1353_v4 = vmov 0   ;;  %s1694_s0 = inlined_call_operand.vmem [shape: f32[3,128], index: 0, kind: input, shape index: {}]   ;;  %s1695_s1 = inlined_call_operand.vmem [shape: f32[32,3], index: 1, kind: input, shape index: {}]   ;;  %s1696_s2 = inlined_call_operand.vmem [shape: f32[32,1], index: 2, kind: input, shape index: {}]   ;;  %s1697_s3 = inlined_call_operand.vmem [shape: f32[2,32,32], index: 3, kind: input, shape index: {}]   ;;  %s1698_s4 = inlined_call_operand.vmem [shape: f32[2,32,1], index: 4, kind: input, shape index: {}]   ;;  %s1699_s5 = inlined_call_operand.vmem [shape: f32[32,1], index: 5, kind: input, shape index: {}]   ;;  %s1700_s6 = inlined_call_operand.<no memory space> [shape: f32[1,1], index: 6, kind: input, shape index: {}]   ;;  %s1701_s7 = inlined_call_operand.hbm [shape: f32[1,1,128], index: 7, kind: output, shape index: {}]  }
   0x1   :  { %v28_v0 = vld [vmem:[%s1694_s0] sm:$0x7]  ;;  %v31_v1 = vld [vmem:[%s1695_s1 + $0x10] sm:$0xff]  ;;  %1276 = vset.pattern.permute.xlu0 %v1353_v4  ;;  %v36_v5 = vld [vmem:[%s1696_s2 + $0x18] sm:$0xff]  ;;  %1277 = vset.pattern.permute.xlu1 %v1353_v4 }
   0x2   :  { %v72_v2 = vsel %vm70_vm0, %v28_v0, 0  ;;  %v65_v3 = vsel %vm57_vm1, %v31_v1, 0  ;;  %v32_v6 = vld [vmem:[%s1695_s1 + $0x18] sm:$0xff]  ;;  %v29_v7 = vld [vmem:[%s1695_s1] sm:$0xff]  ;;  %54 = vperm.xlu0 %1276, %v36_v5   ;;  %v34_v12 = vld [vmem:[%s1696_s2 + $0x8] sm:$0xff]  ;;  %1278 = vset.pattern.permute.xlu2 %v1353_v4 }
   0x3   :  { %v89_v8 = vand.u32 4294901760, %v72_v2  ;;  %v1411_v9 = vand.u32 4294901760, %v65_v3  ;;  %v68_v10 = vsel %vm57_vm1, %v32_v6, 0  ;;  %v59_v11 = vsel %vm57_vm1, %v29_v7, 0  ;;  %44 = vperm.xlu1 %1277, %v34_v12   ;;  %v30_v15 = vld [vmem:[%s1695_s1 + $0x8] sm:$0xff] }
   0x4   :  { %v1418_v13 = vand.u32 4294901760, %v68_v10  ;;  %v91_v14 = vand.u32 4294901760, %v59_v11  ;;  %v62_v18 = vsel %vm57_vm1, %v30_v15, 0 }
   0x5   :  { %1272 = vmatpush.msra.mxu2 %v89_v8  ;;  %v1424_v16 = vsub.f32 %v65_v3, %v1411_v9  ;;  %v140_v17 = vsub.f32 %v72_v2, %v89_v8  ;;  %90 = vmatpush.msra.mxu0 %v89_v8 }
   0x6   :  { %13 = vsyncpa [#allocation4], 0  ;;  %v1428_v19 = vsub.f32 %v68_v10, %v1418_v13  ;;  %v92_v20 = vsub.f32 %v59_v11, %v91_v14  ;;  %v99_v21 = vand.u32 4294901760, %v62_v18  ;;  %v35_v25 = vld [vmem:[%s1696_s2 + $0x10] sm:$0xff]  ;;  %v33_v30 = vld [vmem:[%s1696_s2] sm:$0xff]  ;;  %vm421_vm5 = vcmask 261120  }
   0x7   :  { %v109_v22 = vand.u32 4294901760, %v1424_v16  ;;  %v141_v23 = vand.u32 4294901760, %v140_v17  ;;  %179 = vmatpush.msrb.mxu2 %v140_v17  ;;  %v398_v38 = vld [vmem:[%s1698_s4 + $0x8] sm:$0xff]  ;;  %v397_v40 = vld [vmem:[%s1698_s4] sm:$0xff]  ;;  %v1265_v43 = vld [vmem:[%s1698_s4 + $0x30] sm:$0xff]  ;;  %s1354_s29 = smov [#allocation3]  }
   0x8   :  { %v93_v24 = vand.u32 4294901760, %v92_v20  ;;  %v100_v26 = vsub.f32 %v62_v18, %v99_v21  ;;  %v117_v29 = vand.u32 4294901760, %v1428_v19  ;;  %v1264_v42 = vld [vmem:[%s1698_s4 + $0x28] sm:$0xff]  ;;  %v1192_v44 = vld [vmem:[%s1699_s5] sm:$0xff]  ;;  %v1195_v46 = vld [vmem:[%s1699_s5 + $0x18] sm:$0xff]  ;;  %s1240_s30 = sshll.u32 %s1354_s29, 4  ;;  %s1241_s30 = int_to_ptr.vmem [resolvable:$true] %s1240_s30 }
   0x9   :  { %v110_v27 = vsub.f32 %v1424_v16, %v109_v22  ;;  %v142_v28 = vsub.f32 %v140_v17, %v141_v23  ;;  %261 = vmatpush.msrb.mxu0 %v141_v23  ;;  %v1193_v45 = vld [vmem:[%s1699_s5 + $0x8] sm:$0xff]  ;;  %s1242_s9 = sshll.u32 %s1701_s7, 4  ;;  %s1243_s9 = int_to_ptr.hbm [resolvable:$true] %s1242_s9 }
   0xa   :  { %v94_v31 = vsub.f32 %v92_v20, %v93_v24  ;;  %v101_v32 = vand.u32 4294901760, %v100_v26  ;;  %49 = vperm.xlu0 %1276, %v35_v25   ;;  %v118_v36 = vsub.f32 %v1428_v19, %v117_v29 }
   0xb   :  { %v111_v33 = vand.u32 4294901760, %v110_v27  ;;  %v143_v34 = vand.u32 4294901760, %v142_v28  ;;  %39 = vperm.xlu1 %1277, %v33_v30  }
   0xc   :  { %v95_v35 = vand.u32 4294901760, %v94_v31  ;;  %v102_v37 = vsub.f32 %v100_v26, %v101_v32  ;;  %v119_v39 = vand.u32 4294901760, %v118_v36 }
   0xd   :  { %112 = vmatmul.f32.vlgmr.msra.gmra.mxu2 %v111_v33  ;;  %1273 = vmatpush.msra.mxu3 %v143_v34 }
   0xe   :  { %154 = vmatmul.f32.vlgmr.msra.gmra.mxu3 %v1411_v9  ;;  %96 = vmatmul.f32.vlgmr.msra.gmra.mxu0 %v95_v35  ;;  %v103_v41 = vand.u32 4294901760, %v102_v37 }
   0xf   :  { %144 = vmatpush.msra.mxu1 %v143_v34  ;;  %217 = vmatpush.msrb.mxu3 %v89_v8 }
  0x10   :  { %146 = vmatmul.f32.vlgmr.msra.gmra.mxu1 %v91_v14 }
  0x11   :  { %295 = vmatpush.msrb.mxu1 %v89_v8 }
  0x12   :  { %408 = vperm.xlu0 %1276, %v398_v38  }
  0x13   :  { %403 = vperm.xlu1 %1277, %v397_v40  }
  0x15   :  { %120 = vmatmul.f32.gmra.mxu2 %v119_v39 }
  0x16   :  { %158 = vmatmul.f32.gmra.mxu3 %v1418_v13  ;;  %104 = vmatmul.f32.gmra.mxu0 %v103_v41 }
  0x18   :  { %150 = vmatmul.f32.gmra.mxu1 %v99_v21 }
  0x1a   :  { %809 = vperm.xlu0 %1276, %v1264_v42  }
  0x1b   :  { %814 = vperm.xlu1 %1277, %v1265_v43  }
  0x1d   :  { %182 = vmatmul.f32.vlgmr.msrb.gmra.mxu2 %v92_v20 }
  0x1e   :  { %221 = vmatmul.f32.vlgmr.msrb.gmra.mxu3 %v93_v24  ;;  %263 = vmatmul.f32.vlgmr.msrb.gmra.mxu0 %v91_v14 }
  0x20   :  { %297 = vmatmul.f32.vlgmr.msrb.gmra.mxu1 %v91_v14 }
  0x22   :  { %1198 = vperm.xlu0 %1276, %v1192_v44  }
  0x23   :  { %1203 = vperm.xlu1 %1277, %v1193_v45  }
  0x25   :  { %187 = vmatmul.f32.gmra.mxu2 %v100_v26 }
  0x26   :  { %227 = vmatmul.f32.gmra.mxu3 %v101_v32  ;;  %267 = vmatmul.f32.gmra.mxu0 %v99_v21 }
  0x28   :  { %301 = vmatmul.f32.gmra.mxu1 %v99_v21 }
  0x2a   :  { %1213 = vperm.xlu0 %1276, %v1195_v46  }
  0x2d   :  { %192 = vmatmul.f32.gmra.mxu2 %v1424_v16 }
  0x2e   :  { %233 = vmatmul.f32.gmra.mxu3 %v109_v22  ;;  %271 = vmatmul.f32.gmra.mxu0 %v1411_v9 }
  0x30   :  { %305 = vmatmul.f32.gmra.mxu1 %v1411_v9 }
  0x35   :  { %197 = vmatmul.f32.gmra.mxu2 %v1428_v19 }
  0x36   :  { %239 = vmatmul.f32.gmra.mxu3 %v117_v29  ;;  %275 = vmatmul.f32.gmra.mxu0 %v1418_v13 }
  0x38   :  { %309 = vmatmul.f32.gmra.mxu1 %v1418_v13 }
  0x74   :  { %v55_v61 = vpop.permute.xlu0 %54 }
  0x75   :  { %v45_v49 = vpop.permute.xlu1 %44 }
  0x7c   :  { %v50_v12 = vpop.permute.xlu0 %49 }
  0x7d   :  { %v40_v54 = vpop.permute.xlu1 %39 }
  0x8b   :  { %v97_v47 = vpop.f32.mrf.mxu0 }
  0x8c   :  { %v98_v57 = vadd.f32 %v97_v47, %v40_v54 }
  0x8d   :  { %v147_v48 = vpop.f32.mrf.mxu1 }
  0x8e   :  { %v148_v60 = vadd.f32 %v147_v48, %v98_v57 }
  0x90   :  { %v113_v50 = vpop.f32.mrf.mxu2 }
  0x91   :  { %v155_v51 = vpop.f32.mrf.mxu3  ;;  %v114_v13 = vadd.f32 %v113_v50, %v50_v12 }
  0x93   :  { %v105_v52 = vpop.f32.mrf.mxu0  ;;  %v156_v16 = vadd.f32 %v155_v51, %v114_v13 }
  0x94   :  { %v106_v1 = vadd.f32 %v105_v52, %v45_v49 }
  0x95   :  { %v151_v53 = vpop.f32.mrf.mxu1 }
  0x96   :  { %v152_v5 = vadd.f32 %v151_v53, %v106_v1 }
  0x98   :  { %v121_v55 = vpop.f32.mrf.mxu2 }
  0x99   :  { %v159_v56 = vpop.f32.mrf.mxu3  ;;  %v122_v25 = vadd.f32 %v121_v55, %v55_v61 }
  0x9b   :  { %v264_v58 = vpop.f32.mrf.mxu0  ;;  %v160_v29 = vadd.f32 %v159_v56, %v122_v25  ;;  %v394_v25 = vld [vmem:[%s1697_s3 + $0x8] sm:$0xff] }
  0x9d   :  { %v298_v59 = vpop.f32.mrf.mxu1 }
  0xa0   :  { %v183_v62 = vpop.f32.mrf.mxu2 }
  0xa1   :  { %v184_v63 = vadd.f32 %v183_v62, %v148_v60  ;;  %v222_v0 = vpop.f32.mrf.mxu3 }
  0xa3   :  { %v223_v2 = vadd.f32 %v222_v0, %v184_v63  ;;  %v268_v4 = vpop.f32.mrf.mxu0  ;;  %v393_v63 = vld [vmem:[%s1697_s3] sm:$0xff] }
  0xa5   :  { %v265_v3 = vadd.f32 %v264_v58, %v223_v2  ;;  %v302_v8 = vpop.f32.mrf.mxu1 }
  0xa7   :  { %v1469_v6 = vadd.f32 %v298_v59, %v265_v3 }
  0xa8   :  { %v188_v7 = vpop.f32.mrf.mxu2 }
  0xa9   :  { %v1251_v9 = vmul.f32 -1.442695, %v1469_v6  ;;  %v189_v10 = vadd.f32 %v188_v7, %v152_v5  ;;  %v228_v11 = vpop.f32.mrf.mxu3 }
  0xab   :  { %v229_v14 = vadd.f32 %v228_v11, %v189_v10  ;;  %1279 = vpow2.f32 %v1251_v9  ;;  %v272_v19 = vpop.f32.mrf.mxu0  ;;  %v423_v9 = vsel %vm421_vm5, %v393_v63, 0 }
  0xad   :  { %v269_v15 = vadd.f32 %v268_v4, %v229_v14  ;;  %v306_v24 = vpop.f32.mrf.mxu1 }
  0xaf   :  { %v1472_v17 = vadd.f32 %v302_v8, %v269_v15 }
  0xb0   :  { %v193_v18 = vpop.f32.mrf.mxu2 }
  0xb1   :  { %v1252_v20 = vmul.f32 -1.442695, %v1472_v17  ;;  %v194_v21 = vadd.f32 %v193_v18, %v156_v16  ;;  %v234_v22 = vpop.f32.mrf.mxu3  ;;  %v1280_v23 = vpop.eup %1279 }
  0xb2   :  { %v1475_v27 = vadd.f32 1.0, %v1280_v23 }
  0xb3   :  { %1281 = vpow2.f32 %v1252_v20  ;;  %v235_v26 = vadd.f32 %v234_v22, %v194_v21  ;;  %v276_v37 = vpop.f32.mrf.mxu0  ;;  %v1505_v20 = vand.u32 4294901760, %v423_v9 }
  0xb4   :  { %1283 = vrcp.f32 %v1475_v27  ;;  %v340_v57 = vand.u32 2147483648, %v1475_v27  ;;  %vm334_vm7 = vweird.f32 %v1475_v27  ;;  %v338_v3 = vand.u32 2147483647, %v1475_v27 }
  0xb5   :  { %v273_v28 = vadd.f32 %v272_v19, %v235_v26  ;;  %v310_v39 = vpop.f32.mrf.mxu1 }
  0xb6   :  { %v341_v12 = vor.u32 1.1754944e-38, %v340_v57  ;;  %vm339_vm14 = vcmp.eq.f32.partialorder %v338_v3, 8.507059e+37 }
  0xb7   :  { %v1477_v30 = vadd.f32 %v306_v24, %v273_v28 }
  0xb8   :  { %v198_v31 = vpop.f32.mrf.mxu2 }
  0xb9   :  { %v1282_v32 = vpop.eup %1281  ;;  %v1253_v33 = vmul.f32 -1.442695, %v1477_v30  ;;  %v199_v34 = vadd.f32 %v198_v31, %v160_v29  ;;  %v240_v35 = vpop.f32.mrf.mxu3  ;;  %v455_v31 = vsub.f32 %v423_v9, %v1505_v20 }
  0xba   :  { %v326_v36 = vadd.f32 1.0, %v1282_v32  ;;  %v1284_v41 = vpop.eup %1283 }
  0xbb   :  { %1285 = vpow2.f32 %v1253_v33  ;;  %v241_v38 = vadd.f32 %v240_v35, %v199_v34  ;;  %v330_v46 = vmul.f32 %v1284_v41, %v1475_v27  ;;  %vm335_vm2 = vweird.f32 %v1284_v41 }
  0xbc   :  { %1287 = vrcp.f32 %v326_v36  ;;  %vm349_vm3 = vweird.f32 %v326_v36  ;;  %v355_v61 = vand.u32 2147483648, %v326_v36  ;;  %v353_v0 = vand.u32 2147483647, %v326_v36  ;;  %vm1496_vm9 = vmor %vm334_vm7, %vm335_vm2 }
  0xbd   :  { %v277_v40 = vadd.f32 %v276_v37, %v241_v38  ;;  %v331_v50 = vsub.f32 1.0, %v330_v46  ;;  %v456_v37 = vand.u32 4294901760, %v455_v31 }
  0xbe   :  { %v356_v13 = vor.u32 1.1754944e-38, %v355_v61  ;;  %vm354_vm12 = vcmp.eq.f32.partialorder %v353_v0, 8.507059e+37 }
  0xbf   :  { %v1481_v42 = vadd.f32 %v310_v39, %v277_v40  ;;  %v332_v54 = vmul.f32 %v1284_v41, %v331_v50 }
  0xc1   :  { %v1286_v43 = vpop.eup %1285  ;;  %v1254_v44 = vmul.f32 -1.442695, %v1481_v42  ;;  %v333_v60 = vadd.f32 %v1284_v41, %v332_v54 }
  0xc2   :  { %v1288_v45 = vpop.eup %1287  ;;  %v327_v47 = vadd.f32 1.0, %v1286_v43 }
  0xc3   :  { %v345_v48 = vmul.f32 %v1288_v45, %v326_v36  ;;  %1289 = vpow2.f32 %v1254_v44  ;;  %vm350_vm4 = vweird.f32 %v1288_v45  ;;  %v337_v11 = vsel %vm1496_vm9, %v1284_v41, %v333_v60  ;;  %v395_v41 = vld [vmem:[%s1697_s3 + $0x10] sm:$0xff] }
  0xc4   :  { %1291 = vrcp.f32 %v327_v47  ;;  %v370_v62 = vand.u32 2147483648, %v327_v47  ;;  %v368_v2 = vand.u32 2147483647, %v327_v47  ;;  %vm1491_vm8 = vmor %vm349_vm3, %vm350_vm4  ;;  %vm364_vm10 = vweird.f32 %v327_v47 }
  0xc5   :  { %v346_v49 = vsub.f32 1.0, %v345_v48  ;;  %v342_v21 = vsel %vm339_vm14, %v341_v12, %v337_v11 }
  0xc6   :  { %v371_v14 = vor.u32 1.1754944e-38, %v370_v62  ;;  %vm369_vm13 = vcmp.eq.f32.partialorder %v368_v2, 8.507059e+37  ;;  %v389_v29 = vmul.f32 %v342_v21, %v1469_v6 }
  0xc7   :  { %v347_v52 = vmul.f32 %v1288_v45, %v346_v49 }
  0xc8   :  { %v1521_v39 = vand.u32 4294901760, %v389_v29 }
  0xc9   :  { %v1290_v51 = vpop.eup %1289  ;;  %v348_v58 = vadd.f32 %v1288_v45, %v347_v52 }
  0xca   :  { %v1292_v53 = vpop.eup %1291  ;;  %v328_v55 = vadd.f32 1.0, %v1290_v51  ;;  %v518_v48 = vsub.f32 %v389_v29, %v1521_v39 }
  0xcb   :  { %v360_v56 = vmul.f32 %v1292_v53, %v327_v47  ;;  %vm365_vm6 = vweird.f32 %v1292_v53  ;;  %v352_v7 = vsel %vm1491_vm8, %v1288_v45, %v348_v58  ;;  %v457_v45 = vsub.f32 %v455_v31, %v456_v37  ;;  %v396_v58 = vld [vmem:[%s1697_s3 + $0x18] sm:$0xff] }
  0xcc   :  { %1293 = vrcp.f32 %v328_v55  ;;  %vm366_vm11 = vmor %vm364_vm10, %vm365_vm6  ;;  %v357_v18 = vsel %vm354_vm12, %v356_v13, %v352_v7  ;;  %v385_v24 = vand.u32 2147483648, %v328_v55  ;;  %v383_v28 = vand.u32 2147483647, %v328_v55  ;;  %v400_v13 = vld [vmem:[%s1698_s4 + $0x18] sm:$0xff] }
  0xcd   :  { %v361_v59 = vsub.f32 1.0, %v360_v56  ;;  %v390_v26 = vmul.f32 %v357_v18, %v1472_v17  ;;  %vm379_vm0 = vweird.f32 %v328_v55  ;;  %v458_v52 = vand.u32 4294901760, %v457_v45  ;;  %418 = vperm.xlu2 %1278, %v400_v13   ;;  %v1266_v18 = vld [vmem:[%s1698_s4 + $0x38] sm:$0xff] }
  0xce   :  { %v386_v34 = vor.u32 1.1754944e-38, %v385_v24  ;;  %vm384_vm2 = vcmp.eq.f32.partialorder %v383_v28, 8.507059e+37  ;;  %v519_v57 = vand.u32 4294901760, %v518_v48  ;;  %v404_v28 = vpop.permute.xlu1 %403 }
  0xcf   :  { %v362_v1 = vmul.f32 %v1292_v53, %v361_v59  ;;  %v1517_v35 = vand.u32 4294901760, %v390_v26 }
  0xd0   :  { %v520_v0 = vsub.f32 %v518_v48, %v519_v57 }
  0xd1   :  { %v363_v8 = vadd.f32 %v1292_v53, %v362_v1  ;;  %v512_v44 = vsub.f32 %v390_v26, %v1517_v35  ;;  %v432_v1 = vsel %vm421_vm5, %v396_v58, 0 }
  0xd2   :  { %v1294_v10 = vpop.eup %1293  ;;  %v478_v5 = vand.u32 4294901760, %v432_v1  ;;  %v521_v7 = vand.u32 4294901760, %v520_v0 }
  0xd3   :  { %v367_v15 = vsel %vm366_vm11, %v1292_v53, %v363_v8  ;;  %v375_v16 = vmul.f32 %v1294_v10, %v328_v55  ;;  %vm380_vm15 = vweird.f32 %v1294_v10  ;;  %v513_v51 = vand.u32 4294901760, %v512_v44 }
  0xd4   :  { %v372_v19 = vsel %vm369_vm13, %v371_v14, %v367_v15  ;;  %vm381_vm1 = vmor %vm379_vm0, %vm380_vm15  ;;  %v479_v9 = vsub.f32 %v432_v1, %v478_v5  ;;  %v399_v15 = vld [vmem:[%s1698_s4 + $0x10] sm:$0xff] }
  0xd5   :  { %v391_v22 = vmul.f32 %v372_v19, %v1477_v30  ;;  %v376_v23 = vsub.f32 1.0, %v375_v16  ;;  %v426_v30 = vsel %vm421_vm5, %v394_v25, 0  ;;  %v514_v60 = vsub.f32 %v512_v44, %v513_v51  ;;  %413 = vperm.xlu2 %1278, %v399_v15   ;;  %v1263_v16 = vld [vmem:[%s1698_s4 + $0x20] sm:$0xff]  ;;  %v1194_v19 = vld [vmem:[%s1699_s5 + $0x10] sm:$0xff] }
  0xd6   :  { %v1519_v38 = vand.u32 4294901760, %v426_v30  ;;  %v480_v11 = vand.u32 4294901760, %v479_v9 }
  0xd7   :  { %v377_v27 = vmul.f32 %v1294_v10, %v376_v23  ;;  %v1514_v32 = vand.u32 4294901760, %v391_v22  ;;  %v515_v2 = vand.u32 4294901760, %v514_v60 }
  0xd8   :  { %v463_v46 = vsub.f32 %v426_v30, %v1519_v38  ;;  %v481_v12 = vsub.f32 %v479_v9, %v480_v11 }
  0xd9   :  { %v378_v33 = vadd.f32 %v1294_v10, %v377_v27  ;;  %v506_v40 = vsub.f32 %v391_v22, %v1514_v32 }
  0xda   :  { %v464_v53 = vand.u32 4294901760, %v463_v46  ;;  %v482_v14 = vand.u32 4294901760, %v481_v12 }
  0xdb   :  { %v382_v36 = vsel %vm381_vm1, %v1294_v10, %v378_v33  ;;  %v507_v49 = vand.u32 4294901760, %v506_v40 }
  0xdc   :  { %v387_v17 = vsel %vm384_vm2, %v386_v34, %v382_v36  ;;  %v465_v61 = vsub.f32 %v463_v46, %v464_v53  ;;  %v409_v36 = vpop.permute.xlu0 %408 }
  0xdd   :  { %v392_v6 = vmul.f32 %v387_v17, %v1481_v42  ;;  %v429_v42 = vsel %vm421_vm5, %v395_v41, 0  ;;  %v508_v56 = vsub.f32 %v506_v40, %v507_v49  ;;  %804 = vperm.xlu2 %1278, %v1263_v16  }
  0xde   :  { %v1534_v54 = vand.u32 4294901760, %v429_v42  ;;  %v466_v3 = vand.u32 4294901760, %v465_v61 }
  0xdf   :  { %v446_v43 = vand.u32 4294901760, %v392_v6  ;;  %v509_v63 = vand.u32 4294901760, %v508_v56 }
  0xe0   :  { %v471_v62 = vsub.f32 %v429_v42, %v1534_v54 }
  0xe1   :  { %v500_v47 = vsub.f32 %v392_v6, %v446_v43  ;;  %447 = vmatpush.msra.mxu2 %v446_v43  ;;  %598 = vmatpush.msra.mxu1 %v446_v43 }
  0xe2   :  { %v472_v4 = vand.u32 4294901760, %v471_v62 }
  0xe3   :  { %449 = vmatpush.msra.mxu2 %v1514_v32  ;;  %554 = vmatpush.msra.mxu0 %v500_v47  ;;  %v501_v50 = vand.u32 4294901760, %v500_v47 }
  0xe4   :  { %600 = vmatpush.msra.mxu1 %v1514_v32  ;;  %v473_v8 = vsub.f32 %v471_v62, %v472_v4 }
  0xe5   :  { %451 = vmatpush.msra.mxu2 %v1517_v35  ;;  %557 = vmatpush.msra.mxu0 %v506_v40  ;;  %v502_v55 = vsub.f32 %v500_v47, %v501_v50 }
  0xe6   :  { %602 = vmatpush.msra.mxu1 %v1517_v35  ;;  %v474_v10 = vand.u32 4294901760, %v473_v8  ;;  %819 = vperm.xlu2 %1278, %v1266_v18  }
  0xe7   :  { %453 = vmatpush.msra.mxu2 %v1521_v39  ;;  %560 = vmatpush.msra.mxu0 %v512_v44  ;;  %v503_v59 = vand.u32 4294901760, %v502_v55 }
  0xe8   :  { %604 = vmatpush.msra.mxu1 %v1521_v39  ;;  %459 = vmatmul.f32.vlgmr.msra.gmra.mxu2 %v458_v52 }
  0xe9   :  { %645 = vmatpush.msrb.mxu2 %v501_v50  ;;  %504 = vmatpush.msra.mxu3 %v503_v59 }
  0xea   :  { %563 = vmatpush.msra.mxu0 %v518_v48  ;;  %608 = vmatmul.f32.vlgmr.msra.gmra.mxu1 %v456_v37 }
  0xeb   :  { %649 = vmatpush.msrb.mxu2 %v507_v49  ;;  %510 = vmatpush.msra.mxu3 %v509_v63 }
  0xec   :  { %566 = vmatmul.f32.vlgmr.msra.gmra.mxu0 %v455_v31 }
  0xed   :  { %653 = vmatpush.msrb.mxu2 %v513_v51  ;;  %516 = vmatpush.msra.mxu3 %v515_v2 }
  0xee   :  { %1208 = vperm.xlu2 %1278, %v1194_v19  }
  0xef   :  { %657 = vmatpush.msrb.mxu2 %v519_v57  ;;  %522 = vmatpush.msra.mxu3 %v521_v7 }
  0xf0   :  { %467 = vmatmul.f32.gmra.mxu2 %v466_v3  ;;  %524 = vmatmul.f32.vlgmr.msra.gmra.mxu3 %v1505_v20 }
  0xf1   :  { %688 = vmatpush.msrb.mxu3 %v446_v43 }
  0xf2   :  { %614 = vmatmul.f32.gmra.mxu1 %v464_v53 }
  0xf3   :  { %690 = vmatpush.msrb.mxu3 %v1514_v32 }
  0xf4   :  { %571 = vmatmul.f32.gmra.mxu0 %v463_v46 }
  0xf5   :  { %692 = vmatpush.msrb.mxu3 %v1517_v35 }
  0xf7   :  { %694 = vmatpush.msrb.mxu3 %v1521_v39 }
  0xf8   :  { %475 = vmatmul.f32.gmra.mxu2 %v474_v10  ;;  %528 = vmatmul.f32.gmra.mxu3 %v1519_v38 }
  0xfa   :  { %620 = vmatmul.f32.gmra.mxu1 %v472_v4 }
  0xfc   :  { %576 = vmatmul.f32.gmra.mxu0 %v471_v62 }
 0x100   :  { %483 = vmatmul.f32.gmra.mxu2 %v482_v14  ;;  %532 = vmatmul.f32.gmra.mxu3 %v1534_v54 }
 0x102   :  { %626 = vmatmul.f32.gmra.mxu1 %v480_v11 }
 0x104   :  { %581 = vmatmul.f32.gmra.mxu0 %v479_v9 }
 0x108   :  { %536 = vmatmul.f32.gmra.mxu3 %v478_v5  ;;  %659 = vmatmul.f32.vlgmr.msrb.gmra.mxu2 %v1505_v20 }
 0x110   :  { %663 = vmatmul.f32.gmra.mxu2 %v1519_v38  ;;  %696 = vmatmul.f32.vlgmr.msrb.gmra.mxu3 %v1505_v20 }
 0x118   :  { %667 = vmatmul.f32.gmra.mxu2 %v1534_v54  ;;  %700 = vmatmul.f32.gmra.mxu3 %v1519_v38 }
 0x120   :  { %671 = vmatmul.f32.gmra.mxu2 %v478_v5  ;;  %704 = vmatmul.f32.gmra.mxu3 %v1534_v54 }
 0x127   :  { %v419_v32 = vpop.permute.xlu2 %418 }
 0x128   :  { %708 = vmatmul.f32.gmra.mxu3 %v478_v5 }
 0x12f   :  { %v414_v40 = vpop.permute.xlu2 %413 }
 0x167   :  { %v609_v31 = vpop.f32.mrf.mxu1 }
 0x169   :  { %v567_v20 = vpop.f32.mrf.mxu0 }
 0x16b   :  { %v460_v21 = vpop.f32.mrf.mxu2 }
 0x16c   :  { %v461_v29 = vadd.f32 %v460_v21, %v404_v28 }
 0x16f   :  { %v615_v6 = vpop.f32.mrf.mxu1 }
 0x171   :  { %v572_v17 = vpop.f32.mrf.mxu0 }
 0x173   :  { %v468_v22 = vpop.f32.mrf.mxu2  ;;  %v525_v23 = vpop.f32.mrf.mxu3 }
 0x174   :  { %v526_v33 = vadd.f32 %v525_v23, %v461_v29  ;;  %v469_v37 = vadd.f32 %v468_v22, %v409_v36  ;;  %v1259_v36 = vld [vmem:[%s1697_s3 + $0x20] sm:$0xff] }
 0x176   :  { %v568_v35 = vadd.f32 %v567_v20, %v526_v33 }
 0x177   :  { %v621_v52 = vpop.f32.mrf.mxu1 }
 0x178   :  { %v610_v38 = vadd.f32 %v609_v31, %v568_v35 }
 0x179   :  { %v577_v49 = vpop.f32.mrf.mxu0 }
 0x17b   :  { %v476_v24 = vpop.f32.mrf.mxu2  ;;  %v529_v25 = vpop.f32.mrf.mxu3 }
 0x17c   :  { %v530_v39 = vadd.f32 %v529_v25, %v469_v37  ;;  %v477_v46 = vadd.f32 %v476_v24, %v414_v40 }
 0x17e   :  { %v573_v45 = vadd.f32 %v572_v17, %v530_v39 }
 0x17f   :  { %v627_v4 = vpop.f32.mrf.mxu1 }
 0x180   :  { %v616_v42 = vadd.f32 %v615_v6, %v573_v45 }
 0x181   :  { %v582_v62 = vpop.f32.mrf.mxu0 }
 0x183   :  { %v484_v26 = vpop.f32.mrf.mxu2  ;;  %v533_v27 = vpop.f32.mrf.mxu3 }
 0x184   :  { %v534_v50 = vadd.f32 %v533_v27, %v477_v46  ;;  %v485_v54 = vadd.f32 %v484_v26, %v419_v32 }
 0x186   :  { %v578_v55 = vadd.f32 %v577_v49, %v534_v50 }
 0x188   :  { %v622_v60 = vadd.f32 %v621_v52, %v578_v55 }
 0x18b   :  { %v537_v30 = vpop.f32.mrf.mxu3  ;;  %v660_v34 = vpop.f32.mrf.mxu2 }
 0x18c   :  { %v661_v41 = vadd.f32 %v660_v34, %v610_v38  ;;  %v538_v61 = vadd.f32 %v537_v30, %v485_v54 }
 0x18e   :  { %v583_v2 = vadd.f32 %v582_v62, %v538_v61 }
 0x190   :  { %v628_v10 = vadd.f32 %v627_v4, %v583_v2 }
 0x193   :  { %v664_v43 = vpop.f32.mrf.mxu2  ;;  %v697_v44 = vpop.f32.mrf.mxu3 }
 0x194   :  { %v1572_v47 = vadd.f32 %v697_v44, %v661_v41  ;;  %v665_v51 = vadd.f32 %v664_v43, %v616_v42  ;;  %v823_v44 = vsel %vm421_vm5, %v1259_v36, 0 }
 0x195   :  { %v1608_v54 = vand.u32 4294901760, %v823_v44 }
 0x196   :  { %v1255_v48 = vmul.f32 -1.442695, %v1572_v47 }
 0x198   :  { %1295 = vpow2.f32 %v1255_v48 }
 0x19b   :  { %v701_v53 = vpop.f32.mrf.mxu3  ;;  %v668_v57 = vpop.f32.mrf.mxu2 }
 0x19c   :  { %v1575_v56 = vadd.f32 %v701_v53, %v665_v51  ;;  %v669_v0 = vadd.f32 %v668_v57, %v622_v60  ;;  %v1260_v60 = vld [vmem:[%s1697_s3 + $0x28] sm:$0xff] }
 0x19e   :  { %v1256_v58 = vmul.f32 -1.442695, %v1575_v56  ;;  %v1296_v59 = vpop.eup %1295 }
 0x19f   :  { %v1578_v63 = vadd.f32 1.0, %v1296_v59 }
 0x1a0   :  { %1297 = vpow2.f32 %v1256_v58 }
 0x1a1   :  { %1299 = vrcp.f32 %v1578_v63  ;;  %v739_v31 = vand.u32 2147483648, %v1578_v63  ;;  %vm733_vm8 = vweird.f32 %v1578_v63  ;;  %v737_v39 = vand.u32 2147483647, %v1578_v63 }
 0x1a3   :  { %v705_v1 = vpop.f32.mrf.mxu3  ;;  %v672_v9 = vpop.f32.mrf.mxu2  ;;  %v740_v48 = vor.u32 1.1754944e-38, %v739_v31  ;;  %vm738_vm15 = vcmp.eq.f32.partialorder %v737_v39, 8.507059e+37 }
 0x1a4   :  { %v1580_v3 = vadd.f32 %v705_v1, %v669_v0  ;;  %v673_v11 = vadd.f32 %v672_v9, %v628_v10  ;;  %v855_v1 = vsub.f32 %v823_v44, %v1608_v54 }
 0x1a6   :  { %v1298_v5 = vpop.eup %1297  ;;  %v1257_v7 = vmul.f32 -1.442695, %v1580_v3  ;;  %v856_v9 = vand.u32 4294901760, %v855_v1 }
 0x1a7   :  { %v725_v8 = vadd.f32 1.0, %v1298_v5  ;;  %v1300_v13 = vpop.eup %1299 }
 0x1a8   :  { %1301 = vpow2.f32 %v1257_v7  ;;  %v729_v19 = vmul.f32 %v1300_v13, %v1578_v63  ;;  %vm734_vm3 = vweird.f32 %v1300_v13 }
 0x1a9   :  { %1303 = vrcp.f32 %v725_v8  ;;  %vm748_vm6 = vweird.f32 %v725_v8  ;;  %v754_v34 = vand.u32 2147483648, %v725_v8  ;;  %v752_v17 = vand.u32 2147483647, %v725_v8  ;;  %vm1599_vm10 = vmor %vm733_vm8, %vm734_vm3 }
 0x1aa   :  { %v730_v24 = vsub.f32 1.0, %v729_v19 }
 0x1ab   :  { %v709_v12 = vpop.f32.mrf.mxu3  ;;  %v755_v49 = vor.u32 1.1754944e-38, %v754_v34  ;;  %vm753_vm13 = vcmp.eq.f32.partialorder %v752_v17, 8.507059e+37 }
 0x1ac   :  { %v1584_v14 = vadd.f32 %v709_v12, %v673_v11  ;;  %v731_v27 = vmul.f32 %v1300_v13, %v730_v24 }
 0x1ae   :  { %v1302_v15 = vpop.eup %1301  ;;  %v1258_v16 = vmul.f32 -1.442695, %v1584_v14  ;;  %v732_v30 = vadd.f32 %v1300_v13, %v731_v27 }
 0x1af   :  { %v1304_v18 = vpop.eup %1303  ;;  %v726_v21 = vadd.f32 1.0, %v1302_v15 }
 0x1b0   :  { %v744_v22 = vmul.f32 %v1304_v18, %v725_v8  ;;  %1305 = vpow2.f32 %v1258_v16  ;;  %vm749_vm4 = vweird.f32 %v1304_v18  ;;  %v736_v46 = vsel %vm1599_vm10, %v1300_v13, %v732_v30  ;;  %v1261_v13 = vld [vmem:[%s1697_s3 + $0x30] sm:$0xff] }
 0x1b1   :  { %1307 = vrcp.f32 %v726_v21  ;;  %v769_v35 = vand.u32 2147483648, %v726_v21  ;;  %v767_v38 = vand.u32 2147483647, %v726_v21  ;;  %vm1594_vm9 = vmor %vm748_vm6, %vm749_vm4  ;;  %vm763_vm11 = vweird.f32 %v726_v21 }
 0x1b2   :  { %v745_v23 = vsub.f32 1.0, %v744_v22  ;;  %v741_v55 = vsel %vm738_vm15, %v740_v48, %v736_v46 }
 0x1b3   :  { %v770_v42 = vor.u32 1.1754944e-38, %v769_v35  ;;  %vm768_vm14 = vcmp.eq.f32.partialorder %v767_v38, 8.507059e+37  ;;  %v788_v0 = vmul.f32 %v741_v55, %v1572_v47 }
 0x1b4   :  { %v746_v20 = vmul.f32 %v1304_v18, %v745_v23 }
 0x1b5   :  { %v1624_v11 = vand.u32 4294901760, %v788_v0 }
 0x1b6   :  { %v1306_v25 = vpop.eup %1305  ;;  %v747_v32 = vadd.f32 %v1304_v18, %v746_v20 }
 0x1b7   :  { %v1308_v26 = vpop.eup %1307  ;;  %v727_v28 = vadd.f32 1.0, %v1306_v25  ;;  %v918_v22 = vsub.f32 %v788_v0, %v1624_v11 }
 0x1b8   :  { %v759_v29 = vmul.f32 %v1308_v26, %v726_v21  ;;  %vm764_vm7 = vweird.f32 %v1308_v26  ;;  %v751_v41 = vsel %vm1594_vm9, %v1304_v18, %v747_v32  ;;  %v857_v18 = vsub.f32 %v855_v1, %v856_v9  ;;  %v1262_v32 = vld [vmem:[%s1697_s3 + $0x38] sm:$0xff] }
 0x1b9   :  { %1309 = vrcp.f32 %v727_v28  ;;  %vm765_vm12 = vmor %vm763_vm11, %vm764_vm7  ;;  %v756_v52 = vsel %vm753_vm13, %v755_v49, %v751_v41  ;;  %v784_v59 = vand.u32 2147483648, %v727_v28  ;;  %v782_v63 = vand.u32 2147483647, %v727_v28 }
 0x1ba   :  { %v760_v33 = vsub.f32 1.0, %v759_v29  ;;  %v789_v61 = vmul.f32 %v756_v52, %v1575_v56  ;;  %vm778_vm1 = vweird.f32 %v727_v28  ;;  %v858_v20 = vand.u32 4294901760, %v857_v18 }
 0x1bb   :  { %v785_v5 = vor.u32 1.1754944e-38, %v784_v59  ;;  %vm783_vm3 = vcmp.eq.f32.partialorder %v782_v63, 8.507059e+37  ;;  %v919_v31 = vand.u32 4294901760, %v918_v22  ;;  %v805_v59 = vpop.permute.xlu2 %804 }
 0x1bc   :  { %v761_v37 = vmul.f32 %v1308_v26, %v760_v33  ;;  %v1620_v7 = vand.u32 4294901760, %v789_v61 }
 0x1bd   :  { %v920_v17 = vsub.f32 %v918_v22, %v919_v31 }
 0x1be   :  { %v762_v43 = vadd.f32 %v1308_v26, %v761_v37  ;;  %v912_v16 = vsub.f32 %v789_v61, %v1620_v7  ;;  %v832_v37 = vsel %vm421_vm5, %v1262_v32, 0 }
 0x1bf   :  { %v1310_v45 = vpop.eup %1309  ;;  %v878_v40 = vand.u32 4294901760, %v832_v37  ;;  %v921_v41 = vand.u32 4294901760, %v920_v17 }
 0x1c0   :  { %v766_v50 = vsel %vm765_vm12, %v1308_v26, %v762_v43  ;;  %v774_v51 = vmul.f32 %v1310_v45, %v727_v28  ;;  %vm779_vm0 = vweird.f32 %v1310_v45  ;;  %v913_v25 = vand.u32 4294901760, %v912_v16 }
 0x1c1   :  { %v771_v53 = vsel %vm768_vm14, %v770_v42, %v766_v50  ;;  %vm780_vm2 = vmor %vm778_vm1, %vm779_vm0  ;;  %v879_v44 = vsub.f32 %v832_v37, %v878_v40 }
 0x1c2   :  { %v790_v57 = vmul.f32 %v771_v53, %v1580_v3  ;;  %v775_v58 = vsub.f32 1.0, %v774_v51  ;;  %v826_v3 = vsel %vm421_vm5, %v1260_v60, 0  ;;  %v914_v30 = vsub.f32 %v912_v16, %v913_v25 }
 0x1c3   :  { %v1622_v10 = vand.u32 4294901760, %v826_v3  ;;  %v880_v46 = vand.u32 4294901760, %v879_v44 }
 0x1c4   :  { %v776_v62 = vmul.f32 %v1310_v45, %v775_v58  ;;  %v1617_v2 = vand.u32 4294901760, %v790_v57  ;;  %v915_v38 = vand.u32 4294901760, %v914_v30 }
 0x1c5   :  { %v863_v19 = vsub.f32 %v826_v3, %v1622_v10  ;;  %v881_v48 = vsub.f32 %v879_v44, %v880_v46 }
 0x1c6   :  { %v777_v4 = vadd.f32 %v1310_v45, %v776_v62  ;;  %v906_v12 = vsub.f32 %v790_v57, %v1617_v2 }
 0x1c7   :  { %v864_v26 = vand.u32 4294901760, %v863_v19  ;;  %v882_v49 = vand.u32 4294901760, %v881_v48 }
 0x1c8   :  { %v781_v8 = vsel %vm780_vm2, %v1310_v45, %v777_v4  ;;  %v907_v23 = vand.u32 4294901760, %v906_v12 }
 0x1c9   :  { %v786_v56 = vsel %vm783_vm3, %v785_v5, %v781_v8  ;;  %v865_v34 = vsub.f32 %v863_v19, %v864_v26 }
 0x1ca   :  { %v791_v47 = vmul.f32 %v786_v56, %v1584_v14  ;;  %v829_v14 = vsel %vm421_vm5, %v1261_v13, 0  ;;  %v908_v29 = vsub.f32 %v906_v12, %v907_v23 }
 0x1cb   :  { %v1637_v27 = vand.u32 4294901760, %v829_v14  ;;  %v866_v39 = vand.u32 4294901760, %v865_v34 }
 0x1cc   :  { %v846_v15 = vand.u32 4294901760, %v791_v47  ;;  %v909_v36 = vand.u32 4294901760, %v908_v29 }
 0x1cd   :  { %v871_v35 = vsub.f32 %v829_v14, %v1637_v27 }
 0x1ce   :  { %v900_v21 = vsub.f32 %v791_v47, %v846_v15  ;;  %847 = vmatpush.msrb.mxu0 %v846_v15  ;;  %998 = vmatpush.msra.mxu3 %v846_v15  ;;  %v815_v47 = vpop.permute.xlu1 %814 }
 0x1cf   :  { %v872_v6 = vand.u32 4294901760, %v871_v35 }
 0x1d0   :  { %849 = vmatpush.msrb.mxu0 %v1617_v2  ;;  %954 = vmatpush.msra.mxu2 %v900_v21  ;;  %v901_v24 = vand.u32 4294901760, %v900_v21 }
 0x1d1   :  { %1000 = vmatpush.msra.mxu3 %v1617_v2  ;;  %v873_v43 = vsub.f32 %v871_v35, %v872_v6 }
 0x1d2   :  { %851 = vmatpush.msrb.mxu0 %v1620_v7  ;;  %957 = vmatpush.msra.mxu2 %v906_v12  ;;  %v902_v28 = vsub.f32 %v900_v21, %v901_v24 }
 0x1d3   :  { %1002 = vmatpush.msra.mxu3 %v1620_v7  ;;  %v874_v45 = vand.u32 4294901760, %v873_v43 }
 0x1d4   :  { %853 = vmatpush.msrb.mxu0 %v1624_v11  ;;  %960 = vmatpush.msra.mxu2 %v912_v16  ;;  %v903_v33 = vand.u32 4294901760, %v902_v28 }
 0x1d5   :  { %1004 = vmatpush.msra.mxu3 %v1624_v11  ;;  %859 = vmatmul.f32.vlgmr.msrb.gmra.mxu0 %v858_v20 }
 0x1d6   :  { %1045 = vmatpush.msra.mxu0 %v901_v24  ;;  %904 = vmatpush.msrb.mxu1 %v903_v33  ;;  %v820_v24 = vpop.permute.xlu2 %819 }
 0x1d7   :  { %963 = vmatpush.msra.mxu2 %v918_v22  ;;  %1008 = vmatmul.f32.vlgmr.msra.gmra.mxu3 %v856_v9 }
 0x1d8   :  { %1049 = vmatpush.msra.mxu0 %v907_v23  ;;  %910 = vmatpush.msrb.mxu1 %v909_v36 }
 0x1d9   :  { %966 = vmatmul.f32.vlgmr.msra.gmra.mxu2 %v855_v1  ;;  %v810_v1 = vpop.permute.xlu0 %809 }
 0x1da   :  { %1053 = vmatpush.msra.mxu0 %v913_v25  ;;  %916 = vmatpush.msrb.mxu1 %v915_v38 }
 0x1dc   :  { %1057 = vmatpush.msra.mxu0 %v919_v31  ;;  %922 = vmatpush.msrb.mxu1 %v921_v41 }
 0x1dd   :  { %867 = vmatmul.f32.gmra.mxu0 %v866_v39  ;;  %924 = vmatmul.f32.vlgmr.msrb.gmra.mxu1 %v1608_v54 }
 0x1de   :  { %1088 = vmatpush.msra.mxu1 %v846_v15 }
 0x1df   :  { %1014 = vmatmul.f32.gmra.mxu3 %v864_v26 }
 0x1e0   :  { %1090 = vmatpush.msra.mxu1 %v1617_v2 }
 0x1e1   :  { %971 = vmatmul.f32.gmra.mxu2 %v863_v19 }
 0x1e2   :  { %1092 = vmatpush.msra.mxu1 %v1620_v7 }
 0x1e4   :  { %1094 = vmatpush.msra.mxu1 %v1624_v11 }
 0x1e5   :  { %875 = vmatmul.f32.gmra.mxu0 %v874_v45  ;;  %928 = vmatmul.f32.gmra.mxu1 %v1622_v10 }
 0x1e7   :  { %1020 = vmatmul.f32.gmra.mxu3 %v872_v6 }
 0x1e9   :  { %976 = vmatmul.f32.gmra.mxu2 %v871_v35 }
 0x1ed   :  { %883 = vmatmul.f32.gmra.mxu0 %v882_v49  ;;  %932 = vmatmul.f32.gmra.mxu1 %v1637_v27 }
 0x1ef   :  { %1026 = vmatmul.f32.gmra.mxu3 %v880_v46 }
 0x1f1   :  { %981 = vmatmul.f32.gmra.mxu2 %v879_v44 }
 0x1f5   :  { %936 = vmatmul.f32.gmra.mxu1 %v878_v40  ;;  %1059 = vmatmul.f32.vlgmr.msra.gmra.mxu0 %v1608_v54 }
 0x1fd   :  { %1063 = vmatmul.f32.gmra.mxu0 %v1622_v10  ;;  %1096 = vmatmul.f32.vlgmr.msra.gmra.mxu1 %v1608_v54 }
 0x205   :  { %1067 = vmatmul.f32.gmra.mxu0 %v1637_v27  ;;  %1100 = vmatmul.f32.gmra.mxu1 %v1622_v10 }
 0x20d   :  { %1071 = vmatmul.f32.gmra.mxu0 %v878_v40  ;;  %1104 = vmatmul.f32.gmra.mxu1 %v1637_v27 }
 0x215   :  { %1108 = vmatmul.f32.gmra.mxu1 %v878_v40 }
 0x252   :  { %v860_v42 = vpop.f32.mrf.mxu0 }
 0x253   :  { %v861_v60 = vadd.f32 %v860_v42, %v805_v59 }
 0x25a   :  { %v868_v50 = vpop.f32.mrf.mxu0  ;;  %v925_v51 = vpop.f32.mrf.mxu1 }
 0x25b   :  { %v1009_v61 = vpop.f32.mrf.mxu3  ;;  %v926_v54 = vadd.f32 %v925_v51, %v861_v60  ;;  %v869_v4 = vadd.f32 %v868_v50, %v810_v1 }
 0x25c   :  { %v967_v55 = vpop.f32.mrf.mxu2 }
 0x25d   :  { %v968_v0 = vadd.f32 %v967_v55, %v926_v54 }
 0x25f   :  { %v1010_v3 = vadd.f32 %v1009_v61, %v968_v0 }
 0x262   :  { %v876_v52 = vpop.f32.mrf.mxu0  ;;  %v929_v53 = vpop.f32.mrf.mxu1 }
 0x263   :  { %v930_v5 = vadd.f32 %v929_v53, %v869_v4  ;;  %v1015_v7 = vpop.f32.mrf.mxu3  ;;  %v877_v12 = vadd.f32 %v876_v52, %v815_v47 }
 0x264   :  { %v972_v2 = vpop.f32.mrf.mxu2 }
 0x265   :  { %v973_v10 = vadd.f32 %v972_v2, %v930_v5 }
 0x267   :  { %v1016_v16 = vadd.f32 %v1015_v7, %v973_v10 }
 0x26a   :  { %v884_v57 = vpop.f32.mrf.mxu0  ;;  %v933_v58 = vpop.f32.mrf.mxu1 }
 0x26b   :  { %v934_v18 = vadd.f32 %v933_v58, %v877_v12  ;;  %v1021_v21 = vpop.f32.mrf.mxu3  ;;  %v885_v26 = vadd.f32 %v884_v57, %v820_v24 }
 0x26c   :  { %v977_v15 = vpop.f32.mrf.mxu2 }
 0x26d   :  { %v978_v23 = vadd.f32 %v977_v15, %v934_v18 }
 0x26f   :  { %v1022_v28 = vadd.f32 %v1021_v21, %v978_v23 }
 0x272   :  { %v937_v62 = vpop.f32.mrf.mxu1  ;;  %v1060_v63 = vpop.f32.mrf.mxu0 }
 0x273   :  { %v1061_v8 = vadd.f32 %v1060_v63, %v1010_v3  ;;  %v938_v29 = vadd.f32 %v937_v62, %v885_v26  ;;  %v1027_v36 = vpop.f32.mrf.mxu3 }
 0x274   :  { %v982_v32 = vpop.f32.mrf.mxu2 }
 0x275   :  { %v983_v34 = vadd.f32 %v982_v32, %v938_v29 }
 0x277   :  { %v1028_v6 = vadd.f32 %v1027_v36, %v983_v34 }
 0x27a   :  { %v1064_v56 = vpop.f32.mrf.mxu0  ;;  %v1097_v9 = vpop.f32.mrf.mxu1 }
 0x27b   :  { %v1660_v11 = vadd.f32 %v1097_v9, %v1061_v8  ;;  %v1065_v19 = vadd.f32 %v1064_v56, %v1016_v16 }
 0x27d   :  { %v1267_v13 = vmul.f32 -1.442695, %v1660_v11 }
 0x27f   :  { %1311 = vpow2.f32 %v1267_v13 }
 0x282   :  { %v1101_v22 = vpop.f32.mrf.mxu1  ;;  %v1068_v25 = vpop.f32.mrf.mxu0 }
 0x283   :  { %v1663_v14 = vadd.f32 %v1101_v22, %v1065_v19  ;;  %v1069_v33 = vadd.f32 %v1068_v25, %v1022_v28  ;;  %v1199_v22 = vpop.permute.xlu0 %1198 }
 0x285   :  { %v1312_v20 = vpop.eup %1311  ;;  %v1268_v27 = vmul.f32 -1.442695, %v1663_v14 }
 0x286   :  { %v1124_v31 = vadd.f32 1.0, %v1312_v20 }
 0x287   :  { %1313 = vpow2.f32 %v1268_v27 }
 0x288   :  { %1315 = vrcp.f32 %v1124_v31  ;;  %v1139_v63 = vand.u32 2147483648, %v1124_v31  ;;  %vm1133_vm7 = vweird.f32 %v1124_v31  ;;  %v1137_v2 = vand.u32 2147483647, %v1124_v31 }
 0x28a   :  { %v1105_v30 = vpop.f32.mrf.mxu1  ;;  %v1072_v39 = vpop.f32.mrf.mxu0  ;;  %v1140_v47 = vor.u32 1.1754944e-38, %v1139_v63  ;;  %vm1138_vm13 = vcmp.eq.f32.partialorder %v1137_v2, 8.507059e+37 }
 0x28b   :  { %v1666_v35 = vadd.f32 %v1105_v30, %v1069_v33  ;;  %v1073_v41 = vadd.f32 %v1072_v39, %v1028_v6  ;;  %v1209_v30 = vpop.permute.xlu2 %1208  ;;  %v1214_v39 = vpop.permute.xlu0 %1213 }
 0x28d   :  { %v1314_v17 = vpop.eup %1313  ;;  %v1269_v37 = vmul.f32 -1.442695, %v1666_v35 }
 0x28e   :  { %v1125_v38 = vadd.f32 1.0, %v1314_v17  ;;  %v1316_v40 = vpop.eup %1315 }
 0x28f   :  { %1317 = vpow2.f32 %v1269_v37  ;;  %v1129_v45 = vmul.f32 %v1316_v40, %v1124_v31  ;;  %vm1134_vm4 = vweird.f32 %v1316_v40  ;;  %v1204_v31 = vpop.permute.xlu1 %1203 }
 0x290   :  { %1319 = vrcp.f32 %v1125_v38  ;;  %v1154_v62 = vand.u32 2147483648, %v1125_v38  ;;  %vm1148_vm6 = vweird.f32 %v1125_v38  ;;  %v1152_v0 = vand.u32 2147483647, %v1125_v38  ;;  %vm1676_vm9 = vmor %vm1133_vm7, %vm1134_vm4 }
 0x291   :  { %v1130_v51 = vsub.f32 1.0, %v1129_v45 }
 0x292   :  { %v1109_v43 = vpop.f32.mrf.mxu1  ;;  %v1155_v10 = vor.u32 1.1754944e-38, %v1154_v62  ;;  %vm1153_vm11 = vcmp.eq.f32.partialorder %v1152_v0, 8.507059e+37 }
 0x293   :  { %v1669_v44 = vadd.f32 %v1109_v43, %v1073_v41  ;;  %v1131_v55 = vmul.f32 %v1316_v40, %v1130_v51 }
 0x295   :  { %v1318_v46 = vpop.eup %1317  ;;  %v1270_v48 = vmul.f32 -1.442695, %v1669_v44  ;;  %v1132_v54 = vadd.f32 %v1316_v40, %v1131_v55 }
 0x296   :  { %v1320_v49 = vpop.eup %1319  ;;  %v1126_v42 = vadd.f32 1.0, %v1318_v46 }
 0x297   :  { %v1144_v50 = vmul.f32 %v1320_v49, %v1125_v38  ;;  %1321 = vpow2.f32 %v1270_v48  ;;  %vm1149_vm5 = vweird.f32 %v1320_v49  ;;  %v1136_v9 = vsel %vm1676_vm9, %v1316_v40, %v1132_v54 }
 0x298   :  { %1323 = vrcp.f32 %v1126_v42  ;;  %vm1672_vm8 = vmor %vm1148_vm6, %vm1149_vm5  ;;  %v1169_v3 = vand.u32 2147483648, %v1126_v42  ;;  %v1167_v56 = vand.u32 2147483647, %v1126_v42  ;;  %vm1163_vm12 = vweird.f32 %v1126_v42 }
 0x299   :  { %v1145_v52 = vsub.f32 1.0, %v1144_v50  ;;  %v1141_v18 = vsel %vm1138_vm13, %v1140_v47, %v1136_v9 }
 0x29a   :  { %v1170_v16 = vor.u32 1.1754944e-38, %v1169_v3  ;;  %vm1168_vm15 = vcmp.eq.f32.partialorder %v1167_v56, 8.507059e+37  ;;  %v1188_v20 = vmul.f32 %v1141_v18, %v1660_v11 }
 0x29b   :  { %v1146_v53 = vmul.f32 %v1320_v49, %v1145_v52 }
 0x29c   :  { %v1216_v36 = vmul.f32 %v1199_v22, %v1188_v20 }
 0x29d   :  { %v1322_v57 = vpop.eup %1321  ;;  %v1147_v60 = vadd.f32 %v1320_v49, %v1146_v53 }
 0x29e   :  { %v1324_v58 = vpop.eup %1323  ;;  %v1127_v59 = vadd.f32 1.0, %v1322_v57 }
 0x29f   :  { %v1159_v61 = vmul.f32 %v1324_v58, %v1126_v42  ;;  %v1151_v7 = vsel %vm1672_vm8, %v1320_v49, %v1147_v60  ;;  %vm1164_vm10 = vweird.f32 %v1324_v58  ;;  %v1230_v49 = vstv %s1700_s6 }
 0x2a0   :  { %1325 = vrcp.f32 %v1127_v59  ;;  %v1156_v15 = vsel %vm1153_vm11, %v1155_v10, %v1151_v7  ;;  %vm1165_vm14 = vmor %vm1163_vm12, %vm1164_vm10  ;;  %v1184_v26 = vand.u32 2147483648, %v1127_v59  ;;  %v1182_v29 = vand.u32 2147483647, %v1127_v59 }
 0x2a1   :  { %v1160_v1 = vsub.f32 1.0, %v1159_v61  ;;  %v1189_v24 = vmul.f32 %v1156_v15, %v1663_v14  ;;  %vm1178_vm1 = vweird.f32 %v1127_v59 }
 0x2a2   :  { %v1185_v34 = vor.u32 1.1754944e-38, %v1184_v26  ;;  %vm1183_vm3 = vcmp.eq.f32.partialorder %v1182_v29, 8.507059e+37 }
 0x2a3   :  { %v1161_v8 = vmul.f32 %v1324_v58, %v1160_v1  ;;  %v1217_v32 = vmul.f32 %v1204_v31, %v1189_v24 }
 0x2a5   :  { %v1162_v12 = vadd.f32 %v1324_v58, %v1161_v8  ;;  %v1220_v38 = vadd.f32 %v1217_v32, %v1216_v36 }
 0x2a6   :  { %v1326_v13 = vpop.eup %1325 }
 0x2a7   :  { %v1166_v19 = vsel %vm1165_vm14, %v1324_v58, %v1162_v12  ;;  %v1174_v21 = vmul.f32 %v1326_v13, %v1127_v59  ;;  %vm1179_vm0 = vweird.f32 %v1326_v13 }
 0x2a8   :  { %v1171_v23 = vsel %vm1168_vm15, %v1170_v16, %v1166_v19  ;;  %vm1180_vm2 = vmor %vm1178_vm1, %vm1179_vm0 }
 0x2a9   :  { %v1175_v25 = vsub.f32 1.0, %v1174_v21  ;;  %v1190_v27 = vmul.f32 %v1171_v23, %v1666_v35 }
 0x2ab   :  { %v1176_v28 = vmul.f32 %v1326_v13, %v1175_v25  ;;  %v1218_v17 = vmul.f32 %v1209_v30, %v1190_v27 }
 0x2ad   :  { %v1177_v33 = vadd.f32 %v1326_v13, %v1176_v28  ;;  %v1221_v35 = vadd.f32 %v1220_v38, %v1218_v17 }
 0x2af   :  { %v1181_v37 = vsel %vm1180_vm2, %v1326_v13, %v1177_v33 }
 0x2b0   :  { %v1186_v14 = vsel %vm1183_vm3, %v1185_v34, %v1181_v37 }
 0x2b1   :  { %v1191_v11 = vmul.f32 %v1186_v14, %v1669_v44 }
 0x2b3   :  { %v1219_v6 = vmul.f32 %v1214_v39, %v1191_v11 }
 0x2b5   :  { %v1222_v40 = vadd.f32 %v1221_v35, %v1219_v6 }
 0x2b7   :  { %v1223_v41 = vrot.slane %v1222_v40, 4 }
 0x2b9   :  { %v1224_v43 = vadd.f32 %v1223_v41, %v1222_v40 }
 0x2bb   :  { %v1225_v45 = vrot.slane %v1224_v43, 2 }
 0x2bd   :  { %v1226_v46 = vadd.f32 %v1225_v45, %v1224_v43 }
 0x2bf   :  { %v1227_v48 = vrot.slane %v1226_v46, 1 }
 0x2c1   :  { %v1228_v42 = vadd.f32 %v1227_v48, %v1226_v46 }
 0x2c3   :  { %v1231_v44 = vadd.f32 %v1230_v49, %v1228_v42 }
 0x2c5   :  { %v1271_v50 = vclamps-f32 %v1231_v44, 5.0 }
 0x2c7   :  { %1234 = vst [vmem:[#allocation3] sm:$0x1] %v1271_v50 }
 0x2c8   :  { %1245 = dma.vmem_to_hbm [thread:$0]  %s1241_s30, 16, %s1243_s9, [#allocation4]  }
 0x2c9   :  { %1351 = dma.done.wait [#allocation4], 16  }
 0x2ca   :  { %1352 = vsyncadd [#allocation4], 4294967280 }
 0x2cb   :  { %1250 = vsyncpa [#allocation4], 1 }

</bundles_post_ra>
